<compile_context>
chip_gen: v6e
topology: v6e:2x2x1
jax: 0.10.0
libtpu: 0.0.40
codegen_flags: <defaults>
</compile_context>

<pallas_src>
import functools
import math

import jax
import jax.numpy as jnp
from jax import lax
from jax.experimental import pallas as pl
from jax.experimental.pallas import tpu as pltpu


@functools.lru_cache(maxsize=None)
def _chip_config():
    """(num_partitions, per-input-buffer VMEM byte budget) for this chip."""
    num_partitions = 1
    buf_budget = 4 * 1024 * 1024          # v5e: 16 MiB default scoped VMEM
    try:
        kind = jax.devices()[0].device_kind.lower()
    except Exception:
        return num_partitions, buf_budget
    if "v7" in kind:
        num_partitions = 2                # 2 TensorCores -> shard grid
        buf_budget = 8 * 1024 * 1024      # 32 MiB default scoped VMEM
    elif "v6" in kind:
        buf_budget = 8 * 1024 * 1024      # 32 MiB default scoped VMEM
    return num_partitions, buf_budget


def _sumsq_kernel(x_ref, o_ref, *, tile_rows, tiles_per_part, valid_rows,
                  mask_rows, unroll):
    """Accumulate sum-of-squares of x into a resident (8, cols) block."""
    p = pl.program_id(0)          # partition ("parallel")
    i = pl.program_id(1)          # row tile within partition ("arbitrary")

    @pl.when(i == 0)
    def _init():
        o_ref[...] = jnp.zeros_like(o_ref)

    cols = x_ref.shape[1]
    base = (p * tiles_per_part + i) * tile_rows   # global first row of tile

    def body(g, carry):
        r0 = pl.multiple_of(g * 8, 8)
        xg = x_ref[pl.ds(r0, 8), :].astype(jnp.float32)
        if mask_rows:
            # Zero out rows past the true row count (ragged last tile and/or
            # partition-padding tiles).  Mask BEFORE squaring so undefined
            # out-of-bounds data (possibly NaN) never reaches the sum.
            rid = base + r0 + lax.broadcasted_iota(jnp.int32, (8, cols), 0)
            xg = jnp.where(rid < valid_rows, xg, 0.0)
        o_ref[...] += xg * xg
        return carry

    lax.fori_loop(0, tile_rows // 8, body, 0, unroll=unroll)


def _sum_squares_2d(x2d):
    """sum(x.astype(f32)**2) over a 2-D array via one tiled Pallas reduction."""
    rows, cols = (int(d) for d in x2d.shape)
    num_partitions, buf_budget = _chip_config()
    itemsize = jnp.dtype(x2d.dtype).itemsize

    # Row-tile sized against the per-chip VMEM budget (account for the lane
    # padding to 128 that the VMEM layout imposes on narrow last dims).
    lane_cols = pl.cdiv(cols, 128) * 128
    bytes_per_row_vmem = lane_cols * itemsize
    rows8 = pl.cdiv(rows, 8) * 8
    tile_rows = min(rows8, max(8, (buf_budget // bytes_per_row_vmem) // 8 * 8))
    if tile_rows > 256:
        tile_rows = (tile_rows // 64) * 64   # keep group count a multiple of 8

    tiles_total = pl.cdiv(rows, tile_rows)
    num_partitions = max(1, min(num_partitions, tiles_total))
    tiles_per_part = pl.cdiv(tiles_total, num_partitions)
    covered_rows = num_partitions * tiles_per_part * tile_rows
    mask_rows = covered_rows != rows         # ragged tail or partition padding

    groups = tile_rows // 8
    unroll = groups if groups <= 32 else 8

    kernel = functools.partial(
        _sumsq_kernel, tile_rows=tile_rows, tiles_per_part=tiles_per_part,
        valid_rows=rows, mask_rows=mask_rows, unroll=unroll)

    out_rows = num_partitions * 8
    cost = pl.CostEstimate(
        flops=2 * rows * cols,
        transcendentals=0,
        bytes_accessed=rows * cols * itemsize + out_rows * cols * 4)

    def in_map(p, i):
        # Clamp so partition-padding tiles re-read a valid (masked-out) block
        # instead of issuing a fully out-of-bounds DMA.
        return (jnp.minimum(p * tiles_per_part + i, tiles_total - 1), 0)

    partials = pl.pallas_call(
        kernel,
        out_shape=jax.ShapeDtypeStruct((out_rows, cols), jnp.float32),
        grid_spec=pltpu.PrefetchScalarGridSpec(
            num_scalar_prefetch=0,
            grid=(num_partitions, tiles_per_part),
            in_specs=[pl.BlockSpec((tile_rows, cols), in_map)],
            out_specs=pl.BlockSpec((8, cols), lambda p, i: (p, 0)),
        ),
        compiler_params=pltpu.CompilerParams(
            dimension_semantics=("parallel", "arbitrary")),
        cost_estimate=cost,
    )(x2d)
    # Tiny final reduce, exactly once per factor, outside the pipelined loop.
    return jnp.sum(partials)


def _fro_sum_squares(x):
    """sum(x**2) (in f32) over all elements of one factor tensor."""
    if x.ndim == 0:
        return x.astype(jnp.float32) ** 2
    n = int(x.size)
    if n == 0:
        return jnp.float32(0.0)
    # Pick a 2-D view whose reshape preserves element order (a bitcast under
    # default layouts -> no HBM copy).  Prefer lane-dense column counts.
    rows = cols = None
    for c in (512, 256, 128):
        if n % c == 0:
            rows, cols = n // c, c
            break
    if rows is None:
        cols = int(x.shape[-1])
        rows = n // cols
    x2d = x.reshape(rows, cols)
    return _sum_squares_2d(x2d)


def _fro_impl(factors, weight):
    batch = factors[0][0].shape[0]
    total = jnp.float32(0.0)
    for factor in factors:
        for f in factor:
            total = total + _fro_sum_squares(f)
    return jnp.float32(weight) * total / jnp.float32(batch)


@functools.partial(jax.custom_vjp, nondiff_argnums=(1,))
def fro_forward(factors, weight):
    """Matches Fro.forward: weight * sum_f ||f||_F^2 over all factor tensors,
    divided by the batch size of the first factor tensor."""
    return _fro_impl(factors, weight)


def _fro_fwd(factors, weight):
    return _fro_impl(factors, weight), factors


def _fro_bwd(weight, factors, g):
    # d/df [ weight * sum(f**2) / batch ] = 2 * weight / batch * f
    batch = factors[0][0].shape[0]
    scale = 2.0 * float(weight) / float(batch)
    grads = jax.tree_util.tree_map(
        lambda f: (g * scale * f.astype(jnp.float32)).astype(f.dtype), factors)
    return (grads,)


fro_forward.defvjp(_fro_fwd, _fro_bwd)


if __name__ == "__main__":
    key = jax.random.PRNGKey(0)
    k1, k2, k3 = jax.random.split(key, 3)

    batch, rank = 16, 32          # small (batch, rank) factor tensors
    weight = 0.05                 # Fro(weight=0.05), deterministic in-script

    lhs = jax.random.normal(k1, (batch, rank), dtype=jnp.float32)
    rel = jax.random.normal(k2, (batch, rank), dtype=jnp.float32)
    rhs = jax.random.normal(k3, (batch, rank), dtype=jnp.float32)
    factors = ((lhs, rel, rhs),)  # tuple-of-tuples, as used by the PyTorch module

    out = jax.block_until_ready(fro_forward(factors, weight))

    # Pure-JAX reference (literal translation of the PyTorch forward).
    ref = jnp.float32(0.0)
    for factor in factors:
        for f in factor:
            ref = ref + jnp.float32(weight) * jnp.sum(
                jnp.linalg.norm(f.astype(jnp.float32)) ** 2)
    ref = ref / factors[0][0].shape[0]
    assert jnp.allclose(out, ref, rtol=1e-5, atol=1e-5), (out, ref)

    # Gradient path (custom VJP; backward is plain XLA, no kernel needed).
    grads = jax.block_until_ready(
        jax.grad(lambda fs: fro_forward(fs, weight))(factors))
    expected = 2.0 * weight / batch * lhs
    assert jnp.allclose(grads[0][0], expected, rtol=1e-5, atol=1e-6)

    print("KERNEL_OK")
</pallas_src>

<mosaic_0001>
module attributes {stable_mosaic.version = 11 : i64} {
  func.func @_sumsq_kernel(%arg0: i32, %arg1: i32, %arg2: memref<8x512xf32, #tpu.memory_space<vmem>>, %arg3: memref<8x512xf32, #tpu.memory_space<vmem>>) attributes {dimension_semantics = [#tpu.dimension_semantics<parallel>, #tpu.dimension_semantics<arbitrary>], iteration_bounds = array<i64: 1, 1>, scalar_prefetch = 0 : i64, scratch_operands = 0 : i64, tpu.core_type = #tpu.core_type<tc>, window_params = [{transform_indices = @transform_0, window_bounds = array<i64: 8, 512>}, {transform_indices = @transform_1, window_bounds = array<i64: 8, 512>}]} {
    %c0_i32 = arith.constant 0 : i32
    %0 = arith.cmpi eq, %arg1, %c0_i32 : i32
    %1 = arith.extui %0 : i1 to i32
    %c0_i32_0 = arith.constant 0 : i32
    %2 = arith.cmpi ne, %1, %c0_i32_0 : i32
    scf.if %2 {
      %cst_9 = arith.constant 0.000000e+00 : f32
      %22 = vector.broadcast %cst_9 : f32 to vector<8x512xf32>
      %c0_10 = arith.constant 0 : index
      %c0_11 = arith.constant 0 : index
      %23 = vector.load %arg3[%c0_10, %c0_11] : memref<8x512xf32, #tpu.memory_space<vmem>>, vector<8x512xf32>
      tpu.vector_store %arg3[%c0_10, %c0_11], %22 {strides = array<i32>} : memref<8x512xf32, #tpu.memory_space<vmem>>, vector<8x512xf32>,
    } else {
    }
    %c1_i32 = arith.constant 1 : i32
    %3 = arith.muli %arg0, %c1_i32 : i32
    %4 = arith.addi %3, %arg1 : i32
    %c8_i32 = arith.constant 8 : i32
    %5 = arith.muli %4, %c8_i32 : i32
    %c0_i32_1 = arith.constant 0 : i32
    %c8_i32_2 = arith.constant 8 : i32
    %6 = arith.muli %c0_i32_1, %c8_i32_2 : i32
    %7 = tpu.assume_multiple %6, 8 : i32
    %8 = arith.index_cast %7 : i32 to index
    %c0 = arith.constant 0 : index
    %9 = vector.load %arg2[%8, %c0] : memref<8x512xf32, #tpu.memory_space<vmem>>, vector<8x512xf32>
    %10 = arith.addi %5, %7 : i32
    %11 = tpu.iota {dimensions = array<i32: 0>} : vector<8x512xi32>
    %12 = vector.broadcast %10 : i32 to vector<8x512xi32>
    %13 = arith.addi %12, %11 : vector<8x512xi32>
    %c1_i32_3 = arith.constant 1 : i32
    %14 = vector.broadcast %c1_i32_3 : i32 to vector<8x512xi32>
    %15 = arith.cmpi slt, %13, %14 : vector<8x512xi32>
    %cst = arith.constant 0.000000e+00 : f32
    %16 = vector.broadcast %cst : f32 to vector<8x512xf32>
    %17 = arith.select %15, %9, %16 : vector<8x512xi1>, vector<8x512xf32>
    %c0_4 = arith.constant 0 : index
    %c0_5 = arith.constant 0 : index
    %18 = vector.load %arg3[%c0_4, %c0_5] : memref<8x512xf32, #tpu.memory_space<vmem>>, vector<8x512xf32>
    %19 = arith.mulf %17, %17 : vector<8x512xf32>
    %20 = arith.addf %18, %19 : vector<8x512xf32>
    %c0_6 = arith.constant 0 : index
    %c0_7 = arith.constant 0 : index
    %21 = vector.load %arg3[%c0_6, %c0_7] : memref<8x512xf32, #tpu.memory_space<vmem>>, vector<8x512xf32>
    tpu.vector_store %arg3[%c0_6, %c0_7], %20 {strides = array<i32>} : memref<8x512xf32, #tpu.memory_space<vmem>>, vector<8x512xf32>,
    %c1_i32_8 = arith.constant 1 : i32
    return
  }
  func.func @transform_0(%arg0: i32, %arg1: i32) -> (i32, i32) {
    %c1_i32 = arith.constant 1 : i32
    %0 = arith.muli %arg0, %c1_i32 : i32
    %1 = arith.addi %0, %arg1 : i32
    %c0_i32 = arith.constant 0 : i32
    %2 = arith.minsi %1, %c0_i32 : i32
    %c0_i32_0 = arith.constant 0 : i32
    %c0_i32_1 = arith.constant 0 : i32
    return %2, %c0_i32_0 : i32, i32
  }
  func.func @transform_1(%arg0: i32, %arg1: i32) -> (i32, i32) {
    %c0_i32 = arith.constant 0 : i32
    %c0_i32_0 = arith.constant 0 : i32
    return %arg0, %c0_i32 : i32, i32
  }
}

</mosaic_0001>

<bundles_post_ra>
// kernel: tpu_custom_call.1
= control target key start
LH: loop header
LB: loop body
LE: loop exit
PB: predicated region body
PF: predicated region fallthrough
CT: control target
= control target key end

     0   :  { %6 = vsyncpa [#allocation3], 0  ;;  %s264_s0 = inlined_call_operand.hbm [shape: f32[1,512], index: 0, kind: input, shape index: {}]   ;;  %s265_s1 = inlined_call_operand.hbm [shape: f32[8,512], index: 1, kind: output, shape index: {}]  }
   0x1   :  { %7 = vsyncpa [#allocation4], 0 }
   0x2   :  { %19 = vsyncadd [#allocation3], 448  ;;  %s243_s6 = smov [#allocation2]  }
   0x3   :  { %s25_s7 = sshll.u32 %s243_s6, 4  ;;  %s26_s7 = int_to_ptr.vmem [resolvable:$true] %s25_s7 }
   0x4   :  { %s207_s8 = scalar_lea.vmem %s26_s7, 64  ;;  %s211_s9 = scalar_lea.vmem %s26_s7, 512 }
   0x5   :  { %p208_p0 = scmp.ne.s32.totalorder %s26_s7, %s207_s8  ;;  %p212_p1 = scmp.lt.s32.totalorder %s26_s7, %s26_s7 }
   0x6   :  { %p213_p2 = scmp.lt.s32.totalorder %s211_s9, %s207_s8 }
   0x8   :  { %p214_p3 = por %p213_p2, %p212_p1 }
   0xa   :  { %p215_p4 = pnand %p214_p3, %p208_p0 }
   0xc   :  { %218 = shalt.err (!%p215_p4)
}
   0xd   :  { %s244_s10 = smov 64   ;;  %s245_s11 = smov 4  }
   0xe   :  { %31 = dma.hbm_to_vmem [thread:$0]  %s264_s0, 64, %s26_s7, [#allocation3], %s244_s10, %s244_s10, %s245_s11  }
   0xf   :  { %239 = dma.done.wait [#allocation3], 512  }
  0x10   :  { %240 = vsyncadd [#allocation3], 4294966784  ;;  %v63_v0 = vlaneseq  ;;  %v246_v1 = vmov 1966171168   ;;  %s247_s0 = smov [#allocation5]  }
  0x11   :  { %v81_v2 = vunpack.c.l.s4 %v246_v1  ;;  %v195_v6 = vld.sshfl [vmem:[#allocation2] sm:$0xff pattern:$0x75316420]  ;;  %v196_v7 = vld.sshfl [vmem:[#allocation2 + $0x8] sm:$0xff pattern:$0x75316420] }
  0x12   :  { %v64_v3 = vshrl.u32 %v63_v0, 7  ;;  %v197_v8 = vld.sshfl [vmem:[#allocation2 + $0x10] sm:$0xff pattern:$0x75316420]  ;;  %v108_v10 = vcombine.low %v195_v6, %v196_v7  ;;  %v109_v12 = vcombine.high %v195_v6, %v196_v7  ;;  %s174_s14 = sshll.u32 %s247_s0, 4  ;;  %s175_s14 = int_to_ptr.vmem [resolvable:$true] %s174_s14 }
  0x13   :  { %v82_v4 = vunpack.c.0.s8 %v81_v2  ;;  %v198_v9 = vld.sshfl [vmem:[#allocation2 + $0x18] sm:$0xff pattern:$0x75316420]  ;;  %s219_s15 = scalar_lea.vmem %s175_s14, 512  ;;  %p224_p6 = scmp.lt.s32.totalorder %s175_s14, %s175_s14 }
  0x14   :  { %v110_v11 = vcombine.low %v197_v8, %v198_v9  ;;  %v111_v13 = vcombine.high %v197_v8, %v198_v9  ;;  %vm67_vm0 = vcmp.lt.s32.totalorder %v64_v3, 1  ;;  %p220_p5 = scmp.ne.s32.totalorder %s175_s14, %s219_s15  ;;  %p225_p7 = scmp.lt.s32.totalorder %s219_s15, %s219_s15 }
  0x15   :  { %v85_v5 = vsub.s32 %v82_v4, %v64_v3 }
  0x16   :  { %p226_p8 = por %p225_p7, %p224_p6 }
  0x17   :  { %v118_v14 = vrot.slane %v108_v10, %v85_v5  ;;  %v132_v15 = vrot.slane %v110_v11, %v85_v5  ;;  %v125_v16 = vrot.slane %v109_v12, %v85_v5  ;;  %v139_v17 = vrot.slane %v111_v13, %v85_v5 }
  0x18   :  { %p227_p9 = pnand %p226_p8, %p220_p5 }
  0x19   :  { %v140_v18 = vcombine.low %v118_v14, %v132_v15  ;;  %v142_v19 = vcombine.low %v125_v16, %v139_v17  ;;  %v141_v20 = vcombine.high %v118_v14, %v132_v15  ;;  %v143_v21 = vcombine.high %v125_v16, %v139_v17 }
  0x1b   :  { %v148_v22 = vsel %vm67_vm0, %v140_v18, 0.0  ;;  %v149_v23 = vsel %vm67_vm0, %v142_v19, 0.0  ;;  %v150_v24 = vsel %vm67_vm0, %v141_v20, 0.0  ;;  %v151_v25 = vsel %vm67_vm0, %v143_v21, 0.0 }
  0x1c   :  { %v156_v26 = vmul.f32 %v148_v22, %v148_v22  ;;  %v157_v27 = vmul.f32 %v149_v23, %v149_v23  ;;  %v158_v28 = vmul.f32 %v150_v24, %v150_v24  ;;  %v159_v29 = vmul.f32 %v151_v25, %v151_v25 }
  0x1e   :  { %164 = vst [vmem:[#allocation5] sm:$0xff] %v156_v26  ;;  %165 = vst [vmem:[#allocation5 + $0x8] sm:$0xff] %v157_v27 }
  0x1f   :  { %166 = vst [vmem:[#allocation5 + $0x10] sm:$0xff] %v158_v28  ;;  %167 = vst [vmem:[#allocation5 + $0x18] sm:$0xff] %v159_v29 }
  0x20   :  { %230 = shalt.err (!%p227_p9)
}
  0x21   :  { %177 = dma.vmem_to_hbm [thread:$0]  %s175_s14, 512, %s265_s1, [#allocation4]  }
  0x22   :  { %241 = dma.done.wait [#allocation4], 512  }
  0x23   :  { %242 = vsyncadd [#allocation4], 4294966784 }
  0x24   :  { %181 = vsyncpa [#allocation3], 1 }
  0x25   :  { %182 = vsyncpa [#allocation4], 1 }

</bundles_post_ra>
